<compile_context>
chip_gen: v6e
topology: v6e:2x2x1
jax: 0.10.0
libtpu: 0.0.40
codegen_flags: <defaults>
</compile_context>

<pallas_src>
import functools

import jax
import jax.numpy as jnp
from jax.experimental import pallas as pl
from jax.experimental.pallas import tpu as pltpu


# ----------------------------- kernel -----------------------------

def dm_encoder_kernel(x_ref, w1_ref, b1_ref, w2_ref, b2_ref, w3_ref, b3_ref, o_ref):
    # x: (tb, d_in) f32; wK: (inK, outK) bf16; bK: (1, outK) f32; o: (tb, d_out) f32
    x = x_ref[...].astype(jnp.bfloat16)          # cast on VPU in-kernel (MXU-native inputs)

    # Layer 1: MXU matmul (bf16 in, f32 accumulate); bias + ReLU in f32 on VPU.
    h = jnp.dot(x, w1_ref[...], preferred_element_type=jnp.float32) + b1_ref[...]
    h = jnp.maximum(h, 0.0).astype(jnp.bfloat16)

    # Layer 2
    h = jnp.dot(h, w2_ref[...], preferred_element_type=jnp.float32) + b2_ref[...]
    h = jnp.maximum(h, 0.0).astype(jnp.bfloat16)

    # Layer 3 (no activation)
    h = jnp.dot(h, w3_ref[...], preferred_element_type=jnp.float32) + b3_ref[...]
    o_ref[...] = h.astype(o_ref.dtype)


# ----------------------------- wrapper -----------------------------

def _round_up(x, m):
    return ((x + m - 1) // m) * m


def prepare_params(params):
    """Hoist the per-call weight prep: bf16 weights (in,out), f32 biases (1,out). Call once."""
    out = {}
    for i in (1, 2, 3):
        out[f"w{i}"] = params[f"w{i}"].astype(jnp.bfloat16)
        out[f"b{i}"] = params[f"b{i}"].reshape(1, -1).astype(jnp.float32)
    return out


def _xla_forward(dm, p):
    """Fused XLA fast path (same numerics as the kernel: bf16 matmul inputs, f32 accumulate)."""
    h = jnp.dot(dm.astype(jnp.bfloat16), p["w1"], preferred_element_type=jnp.float32) + p["b1"]
    h = jnp.maximum(h, 0.0).astype(jnp.bfloat16)
    h = jnp.dot(h, p["w2"], preferred_element_type=jnp.float32) + p["b2"]
    h = jnp.maximum(h, 0.0).astype(jnp.bfloat16)
    return jnp.dot(h, p["w3"], preferred_element_type=jnp.float32) + p["b3"]


def dm_encoder_forward(dm, prepared_params, *, min_pallas_batch=64):
    """dm: (B, num_encoder_obs) or (num_encoder_obs,) float32.

    prepared_params: output of prepare_params(). Returns f32 (B, d_out) (or (d_out,))."""
    p = prepared_params
    squeeze = dm.ndim == 1
    if squeeze:
        dm = dm[None, :]

    B, d_in = dm.shape
    h1 = p["w1"].shape[1]
    h2 = p["w2"].shape[1]
    d_out = p["w3"].shape[1]

    # Tiny batches: the pallas launch + padding would dwarf the ~45 KFLOP of math.
    if B < min_pallas_batch:
        out = _xla_forward(dm, p)
        return out[0] if squeeze else out

    # --- batch tiling: few, balanced, 8-aligned tiles (not capped at MXU row fill) ---
    b8 = _round_up(B, 8)
    TB_MAX = 2048                       # ~3.3 MiB of double-buffered x/o at f32; fine everywhere
    n_steps = pl.cdiv(b8, TB_MAX)
    if n_steps > 1 and n_steps % 2 == 1:
        n_steps += 1                    # even step count -> balanced v7x megacore split
    tb = _round_up(pl.cdiv(b8, n_steps), 8)
    b_pad = n_steps * tb

    x = dm if b_pad == B else jnp.pad(dm, ((0, b_pad - B), (0, 0)))   # rows only; cols stay 187

    # --- right-size VMEM from the actual resident set (no arbitrary generation cap) ---
    weight_bytes = (d_in * h1 + h1 * h2 + h2 * d_out) * 2 + (h1 + h2 + d_out) * 4
    act_bytes = tb * (d_in + d_out) * 4           # f32 x in + f32 out per step
    inter_bytes = tb * (h1 + h2) * 4 * 2          # f32/bf16 intermediates (rough)
    vmem_limit = int(min(max(2 * (2 * weight_bytes + 2 * act_bytes + inter_bytes),
                             4 << 20), 32 << 20))

    const = lambda shape: pl.BlockSpec(shape, lambda i: (0, 0))

    out_padded = pl.pallas_call(
        dm_encoder_kernel,
        out_shape=jax.ShapeDtypeStruct((b_pad, d_out), jnp.float32),
        grid=(n_steps,),
        in_specs=[
            pl.BlockSpec((tb, d_in), lambda i: (i, 0)),     # x: tiled over batch, full 187 cols
            const(p["w1"].shape), const(p["b1"].shape),     # weights/biases: VMEM-resident
            const(p["w2"].shape), const(p["b2"].shape),
            const(p["w3"].shape), const(p["b3"].shape),
        ],
        out_specs=pl.BlockSpec((tb, d_out), lambda i: (i, 0)),   # narrow real-width output
        compiler_params=pltpu.CompilerParams(
            dimension_semantics=("parallel",),              # shard batch across TCs (v7x)
            vmem_limit_bytes=vmem_limit,
        ),
    )(x, p["w1"], p["b1"], p["w2"], p["b2"], p["w3"], p["b3"])

    out = out_padded if b_pad == B else out_padded[:B]      # row slice only (no column slice)
    return out[0] if squeeze else out


# ----------------------------- params / references -----------------------------

def init_params(key, num_encoder_obs, encoder_hidden_dims):
    """Deterministic synthetic init (uniform like torch.nn.Linear default), stored (in,out)."""
    dims = [num_encoder_obs] + list(encoder_hidden_dims)
    params = {}
    keys = jax.random.split(key, 2 * (len(dims) - 1))
    for i in range(len(dims) - 1):
        fan_in, fan_out = dims[i], dims[i + 1]
        bound = 1.0 / jnp.sqrt(fan_in)
        params[f"w{i+1}"] = jax.random.uniform(
            keys[2 * i], (fan_in, fan_out), jnp.float32, -bound, bound
        )
        params[f"b{i+1}"] = jax.random.uniform(
            keys[2 * i + 1], (1, fan_out), jnp.float32, -bound, bound
        )
    return params


def reference_forward_f32(dm, params):
    h = jnp.maximum(dm @ params["w1"] + params["b1"], 0.0)
    h = jnp.maximum(h @ params["w2"] + params["b2"], 0.0)
    return h @ params["w3"] + params["b3"]


def reference_forward_bf16(dm, params):
    # Same numerics as the kernel: bf16 matmul inputs, f32 accumulate/bias/ReLU.
    bf = lambda a: a.astype(jnp.bfloat16)
    h = jnp.dot(bf(dm), bf(params["w1"]), preferred_element_type=jnp.float32) + params["b1"]
    h = jnp.maximum(h, 0.0)
    h = jnp.dot(bf(h), bf(params["w2"]), preferred_element_type=jnp.float32) + params["b2"]
    h = jnp.maximum(h, 0.0)
    return jnp.dot(bf(h), bf(params["w3"]), preferred_element_type=jnp.float32) + params["b3"]


# ----------------------------- test -----------------------------

if __name__ == "__main__":
    num_encoder_obs = 187
    encoder_hidden_dims = [64, 32, 16]

    key = jax.random.PRNGKey(0)
    k_param, k_small, k_large = jax.random.split(key, 3)
    params = init_params(k_param, num_encoder_obs, encoder_hidden_dims)
    prepared = prepare_params(params)

    fwd = jax.jit(functools.partial(dm_encoder_forward), static_argnames=("min_pallas_batch",))

    cases = (
        ("small_pallas", k_small, 8, 0),      # force the Pallas path at a tiny shape
        ("ragged_pallas", k_large, 300, 64),  # default path: single 304-row tile, 16-col output
        ("small_fastpath", k_small, 8, 64),   # tiny-batch fused-XLA fast path
    )
    for name, k, batch, min_pb in cases:
        dm = jax.random.normal(k, (batch, num_encoder_obs), jnp.float32)

        out = fwd(dm, prepared, min_pallas_batch=min_pb)
        out = jax.block_until_ready(out)
        assert out.shape == (batch, encoder_hidden_dims[-1]), (name, out.shape)

        # Exact-semantics reference (bf16 matmul inputs, f32 accumulate).
        ref_bf16 = reference_forward_bf16(dm, params)
        assert jnp.allclose(out, ref_bf16, atol=2e-3, rtol=2e-3), f"{name}: mismatch vs bf16 ref"

        # Sanity vs full-f32 math (looser tolerance due to bf16 matmul inputs).
        ref_f32 = reference_forward_f32(dm, params)
        assert jnp.allclose(out, ref_f32, atol=5e-2, rtol=5e-2), f"{name}: mismatch vs f32 ref"

    # 1-D input, matching the PyTorch module's "usually shape (187)" usage.
    dm1 = jax.random.normal(k_small, (num_encoder_obs,), jnp.float32)
    out1 = jax.block_until_ready(dm_encoder_forward(dm1, prepared))
    assert out1.shape == (encoder_hidden_dims[-1],)
    assert jnp.allclose(out1, reference_forward_bf16(dm1[None, :], params)[0],
                        atol=2e-3, rtol=2e-3), "1d: mismatch vs bf16 ref"

    print("KERNEL_OK")
</pallas_src>

<mosaic_0001>
module attributes {stable_mosaic.version = 11 : i64} {
  func.func @dm_encoder_kernel(%arg0: i32, %arg1: memref<8x187xf32, #tpu.memory_space<vmem>>, %arg2: memref<187x64xbf16, #tpu.memory_space<vmem>>, %arg3: memref<1x64xf32, #tpu.memory_space<vmem>>, %arg4: memref<64x32xbf16, #tpu.memory_space<vmem>>, %arg5: memref<1x32xf32, #tpu.memory_space<vmem>>, %arg6: memref<32x16xbf16, #tpu.memory_space<vmem>>, %arg7: memref<1x16xf32, #tpu.memory_space<vmem>>, %arg8: memref<8x16xf32, #tpu.memory_space<vmem>>) attributes {dimension_semantics = [#tpu.dimension_semantics<parallel>], iteration_bounds = array<i64: 1>, scalar_prefetch = 0 : i64, scratch_operands = 0 : i64, tpu.core_type = #tpu.core_type<tc>, window_params = [{transform_indices = @transform_0, window_bounds = array<i64: 8, 187>}, {pipeline_mode = #tpu.pipeline_mode<synchronous>, transform_indices = @transform_1, window_bounds = array<i64: 187, 64>}, {pipeline_mode = #tpu.pipeline_mode<synchronous>, transform_indices = @transform_2, window_bounds = array<i64: 1, 64>}, {pipeline_mode = #tpu.pipeline_mode<synchronous>, transform_indices = @transform_3, window_bounds = array<i64: 64, 32>}, {pipeline_mode = #tpu.pipeline_mode<synchronous>, transform_indices = @transform_4, window_bounds = array<i64: 1, 32>}, {pipeline_mode = #tpu.pipeline_mode<synchronous>, transform_indices = @transform_5, window_bounds = array<i64: 32, 16>}, {pipeline_mode = #tpu.pipeline_mode<synchronous>, transform_indices = @transform_6, window_bounds = array<i64: 1, 16>}, {transform_indices = @transform_7, window_bounds = array<i64: 8, 16>}]} {
    %c0 = arith.constant 0 : index
    %c0_0 = arith.constant 0 : index
    %0 = vector.load %arg1[%c0, %c0_0] : memref<8x187xf32, #tpu.memory_space<vmem>>, vector<8x187xf32>
    %1 = arith.truncf %0 : vector<8x187xf32> to vector<8x187xbf16>
    %c0_1 = arith.constant 0 : index
    %c0_2 = arith.constant 0 : index
    %2 = vector.load %arg2[%c0_1, %c0_2] : memref<187x64xbf16, #tpu.memory_space<vmem>>, vector<187x64xbf16>
    %cst = arith.constant dense<0.000000e+00> : vector<8x64xf32>
    %3 = tpu.matmul %1, %2, %cst {dimension_numbers = #tpu.dot_dimension_numbers<[1], [0], [0], [1], [0, 0, 1, 1], [], []>} : vector<8x187xbf16>, vector<187x64xbf16>, vector<8x64xf32> -> vector<8x64xf32>
    %c0_3 = arith.constant 0 : index
    %c0_4 = arith.constant 0 : index
    %4 = vector.load %arg3[%c0_3, %c0_4] : memref<1x64xf32, #tpu.memory_space<vmem>>, vector<1x64xf32>
    %5 = vector.broadcast %4 : vector<1x64xf32> to vector<8x64xf32>
    %6 = arith.addf %3, %5 : vector<8x64xf32>
    %cst_5 = arith.constant 0.000000e+00 : f32
    %7 = vector.broadcast %cst_5 : f32 to vector<8x64xf32>
    %8 = arith.maximumf %6, %7 : vector<8x64xf32>
    %9 = arith.truncf %8 : vector<8x64xf32> to vector<8x64xbf16>
    %c0_6 = arith.constant 0 : index
    %c0_7 = arith.constant 0 : index
    %10 = vector.load %arg4[%c0_6, %c0_7] : memref<64x32xbf16, #tpu.memory_space<vmem>>, vector<64x32xbf16>
    %cst_8 = arith.constant dense<0.000000e+00> : vector<8x32xf32>
    %11 = tpu.matmul %9, %10, %cst_8 {dimension_numbers = #tpu.dot_dimension_numbers<[1], [0], [0], [1], [0, 0, 1, 1], [], []>} : vector<8x64xbf16>, vector<64x32xbf16>, vector<8x32xf32> -> vector<8x32xf32>
    %c0_9 = arith.constant 0 : index
    %c0_10 = arith.constant 0 : index
    %12 = vector.load %arg5[%c0_9, %c0_10] : memref<1x32xf32, #tpu.memory_space<vmem>>, vector<1x32xf32>
    %13 = vector.broadcast %12 : vector<1x32xf32> to vector<8x32xf32>
    %14 = arith.addf %11, %13 : vector<8x32xf32>
    %cst_11 = arith.constant 0.000000e+00 : f32
    %15 = vector.broadcast %cst_11 : f32 to vector<8x32xf32>
    %16 = arith.maximumf %14, %15 : vector<8x32xf32>
    %17 = arith.truncf %16 : vector<8x32xf32> to vector<8x32xbf16>
    %c0_12 = arith.constant 0 : index
    %c0_13 = arith.constant 0 : index
    %18 = vector.load %arg6[%c0_12, %c0_13] : memref<32x16xbf16, #tpu.memory_space<vmem>>, vector<32x16xbf16>
    %cst_14 = arith.constant dense<0.000000e+00> : vector<8x16xf32>
    %19 = tpu.matmul %17, %18, %cst_14 {dimension_numbers = #tpu.dot_dimension_numbers<[1], [0], [0], [1], [0, 0, 1, 1], [], []>} : vector<8x32xbf16>, vector<32x16xbf16>, vector<8x16xf32> -> vector<8x16xf32>
    %c0_15 = arith.constant 0 : index
    %c0_16 = arith.constant 0 : index
    %20 = vector.load %arg7[%c0_15, %c0_16] : memref<1x16xf32, #tpu.memory_space<vmem>>, vector<1x16xf32>
    %21 = vector.broadcast %20 : vector<1x16xf32> to vector<8x16xf32>
    %22 = arith.addf %19, %21 : vector<8x16xf32>
    %c0_17 = arith.constant 0 : index
    %c0_18 = arith.constant 0 : index
    %23 = vector.load %arg8[%c0_17, %c0_18] : memref<8x16xf32, #tpu.memory_space<vmem>>, vector<8x16xf32>
    tpu.vector_store %arg8[%c0_17, %c0_18], %22 {strides = array<i32>} : memref<8x16xf32, #tpu.memory_space<vmem>>, vector<8x16xf32>,
    return
  }
  func.func @transform_0(%arg0: i32) -> (i32, i32) {
    %c0_i32 = arith.constant 0 : i32
    %c0_i32_0 = arith.constant 0 : i32
    return %arg0, %c0_i32 : i32, i32
  }
  func.func @transform_1(%arg0: i32) -> (i32, i32) {
    %c0_i32 = arith.constant 0 : i32
    %c0_i32_0 = arith.constant 0 : i32
    %c0_i32_1 = arith.constant 0 : i32
    return %c0_i32, %c0_i32_0 : i32, i32
  }
  func.func @transform_2(%arg0: i32) -> (i32, i32) {
    %c0_i32 = arith.constant 0 : i32
    %c0_i32_0 = arith.constant 0 : i32
    %c0_i32_1 = arith.constant 0 : i32
    return %c0_i32, %c0_i32_0 : i32, i32
  }
  func.func @transform_3(%arg0: i32) -> (i32, i32) {
    %c0_i32 = arith.constant 0 : i32
    %c0_i32_0 = arith.constant 0 : i32
    %c0_i32_1 = arith.constant 0 : i32
    return %c0_i32, %c0_i32_0 : i32, i32
  }
  func.func @transform_4(%arg0: i32) -> (i32, i32) {
    %c0_i32 = arith.constant 0 : i32
    %c0_i32_0 = arith.constant 0 : i32
    %c0_i32_1 = arith.constant 0 : i32
    return %c0_i32, %c0_i32_0 : i32, i32
  }
  func.func @transform_5(%arg0: i32) -> (i32, i32) {
    %c0_i32 = arith.constant 0 : i32
    %c0_i32_0 = arith.constant 0 : i32
    %c0_i32_1 = arith.constant 0 : i32
    return %c0_i32, %c0_i32_0 : i32, i32
  }
  func.func @transform_6(%arg0: i32) -> (i32, i32) {
    %c0_i32 = arith.constant 0 : i32
    %c0_i32_0 = arith.constant 0 : i32
    %c0_i32_1 = arith.constant 0 : i32
    return %c0_i32, %c0_i32_0 : i32, i32
  }
  func.func @transform_7(%arg0: i32) -> (i32, i32) {
    %c0_i32 = arith.constant 0 : i32
    %c0_i32_0 = arith.constant 0 : i32
    return %arg0, %c0_i32 : i32, i32
  }
}

</mosaic_0001>

<bundles_post_ra>
// kernel: dm_encoder_forward.1
= control target key start
LH: loop header
LB: loop body
LE: loop exit
PB: predicated region body
PF: predicated region fallthrough
CT: control target
= control target key end

     0   :  { %v452_v1 = vmov 0   ;;  %v453_v4 = vmov 0.0   ;;  %vm134_vm0 = vcmask 482304   ;;  %s577_s0 = inlined_call_operand.vmem [shape: f32[8,187], index: 0, kind: input, shape index: {}]   ;;  %s578_s1 = inlined_call_operand.vmem [shape: bf16[187,64], index: 1, kind: input, shape index: {}]   ;;  %s579_s2 = inlined_call_operand.vmem [shape: f32[1,64], index: 2, kind: input, shape index: {}]   ;;  %s580_s3 = inlined_call_operand.vmem [shape: bf16[64,32], index: 3, kind: input, shape index: {}]   ;;  %s581_s4 = inlined_call_operand.vmem [shape: f32[1,32], index: 4, kind: input, shape index: {}]   ;;  %s582_s5 = inlined_call_operand.vmem [shape: bf16[32,16], index: 5, kind: input, shape index: {}]   ;;  %s583_s6 = inlined_call_operand.vmem [shape: f32[1,16], index: 6, kind: input, shape index: {}]   ;;  %s584_s7 = inlined_call_operand.hbm [shape: f32[8,16], index: 7, kind: output, shape index: {}]  }
   0x1   :  { %v412_v0 = vld [vmem:[%s578_s1 + $0x38] sm:$0xff]   ;;  %145 = vmatprep.subr.bf16.mxu0 %v452_v1  ;;  %v413_v2 = vld [vmem:[%s578_s1 + $0x30] sm:$0xff]   ;;  %v414_v3 = vld [vmem:[%s578_s1 + $0x28] sm:$0xff]   ;;  %387 = vmatprep.subr.bf16.mxu1 %v453_v4 }
   0x2   :  { %146 = vmatpush1.bf16.msra.mxu0 %v412_v0  ;;  %v415_v5 = vld [vmem:[%s578_s1 + $0x20] sm:$0xff]   ;;  %v29_v6 = vld [vmem:[%s577_s0 + $0x8] sm:$0xff]  ;;  %v424_v8 = vld [vmem:[%s580_s3 + $0x18] sm:$0xff]  }
   0x3   :  { %147 = vmatprep.subr.bf16.mxu0 %v452_v1  ;;  %v31_v7 = vpack.c.bf16 %v29_v6, %v29_v6  ;;  %v416_v9 = vld [vmem:[%s578_s1 + $0x18] sm:$0xff]   ;;  %v425_v10 = vld [vmem:[%s580_s3 + $0x10] sm:$0xff]   ;;  %388 = vmatpush3.bf16.msra.mxu1 %v424_v8 }
   0x4   :  { %389 = vmatprep.subr.bf16.mxu1 %v453_v4 }
   0x5   :  { %368 = vmatprep.mubr.msk.bf16.mxu0 %vm134_vm0, %v31_v7 }
   0x6   :  { %148 = vmatpush1.bf16.msra.mxu0 %v413_v2 }
   0x7   :  { %149 = vmatprep.subr.bf16.mxu0 %v452_v1 }
   0xa   :  { %150 = vmatpush1.bf16.msra.mxu0 %v414_v3 }
   0xb   :  { %151 = vmatprep.subr.bf16.mxu0 %v452_v1 }
   0xe   :  { %152 = vmatpush1.bf16.msra.mxu0 %v415_v5 }
   0xf   :  { %153 = vmatprep.subr.bf16.mxu0 %v452_v1 }
  0x10   :  { %12 = vsyncpa [#allocation3], 0  ;;  %v417_v11 = vld [vmem:[%s578_s1 + $0x10] sm:$0xff]   ;;  %390 = vmatpush3.bf16.msra.mxu1 %v425_v10  ;;  %vm138_vm1 = vcmask 1044480   ;;  %v418_v12 = vld [vmem:[%s578_s1 + $0x8] sm:$0xff]   ;;  %vm139_vm2 = vcmask 1045504  }
  0x11   :  { %391 = vmatprep.subr.bf16.mxu1 %v453_v4  ;;  %v454_v13 = vmov 65535   ;;  %v419_v15 = vld [vmem:[%s578_s1] sm:$0xff]   ;;  %v420_v16 = vld [vmem:[%s578_s1 + $0x58] sm:$0x3f]   ;;  %v421_v19 = vld [vmem:[%s578_s1 + $0x50] sm:$0xff]   ;;  %vm455_vm3 = vmmov 0  }
  0x12   :  { %154 = vmatpush1.bf16.msra.mxu0 %v416_v9  ;;  %v140_v14 = vsel %vm138_vm1, 4294967295, %v454_v13  ;;  %v422_v20 = vld [vmem:[%s578_s1 + $0x48] sm:$0xff]   ;;  %v423_v21 = vld [vmem:[%s578_s1 + $0x40] sm:$0xff]   ;;  %395 = vmatprep.mubr.msk.bf16.mxu1 %vm455_vm3, %v453_v4  ;;  %vm226_vm4 = vcmask 523264   ;;  %vm295_vm5 = vcmask 261120   ;;  %s456_s20 = smov [#allocation2]  }
  0x13   :  { %155 = vmatprep.subr.bf16.mxu0 %v452_v1  ;;  %v141_v17 = vsel %vm139_vm2, %v140_v14, 0  ;;  %v28_v22 = vld [vmem:[%s577_s0] sm:$0xff]  ;;  %v426_v24 = vld [vmem:[%s580_s3 + $0x8] sm:$0xff]   ;;  %vm339_vm6 = vcmask 130048  }
  0x14   :  { %v143_v18 = vand.u32 %v420_v16, %v141_v17  ;;  %v30_v23 = vpack.c.bf16 %v28_v22, %v28_v22  ;;  %392 = vmatpush3.bf16.msra.mxu1 %v426_v24  ;;  %v427_v25 = vld [vmem:[%s580_s3] sm:$0xff]   ;;  %v428_v32 = vld [vmem:[%s582_s5 + $0x8] sm:$0xff]  }
  0x15   :  { %393 = vmatprep.subr.bf16.mxu1 %v453_v4  ;;  %v355_v26 = vld [vmem:[%s579_s2] ss:$0 sm:$0xff] }
  0x16   :  { %156 = vmatpush1.bf16.msra.mxu0 %v417_v11  ;;  %v429_v35 = vld [vmem:[%s582_s5] sm:$0xff]   ;;  %s347_s5 = sshll.u32 %s456_s20, 4  ;;  %s348_s5 = int_to_ptr.vmem [resolvable:$true] %s347_s5 }
  0x17   :  { %157 = vmatprep.subr.bf16.mxu0 %v452_v1  ;;  %v369_v36 = vld [vmem:[%s581_s4] ss:$0 sm:$0xff]  ;;  %s430_s4 = scalar_lea.vmem %s348_s5, 128  ;;  %p435_p1 = scmp.lt.s32.totalorder %s348_s5, %s348_s5 }
  0x18   :  { %394 = vmatpush3.bf16.msra.mxu1 %v427_v25  ;;  %v375_v44 = vld [vmem:[%s583_s6] ss:$0 sm:$0xff]  ;;  %p431_p0 = scmp.ne.s32.totalorder %s348_s5, %s430_s4  ;;  %p436_p2 = scmp.lt.s32.totalorder %s430_s4, %s430_s4 }
  0x19   :  { %399 = vmatprep.subr.bf16.mxu1 %v453_v4 }
  0x1a   :  { %158 = vmatpush1.bf16.msra.mxu0 %v418_v12  ;;  %p437_p3 = por %p436_p2, %p435_p1 }
  0x1b   :  { %159 = vmatprep.subr.bf16.mxu0 %v452_v1 }
  0x1c   :  { %p438_p4 = pnand %p437_p3, %p431_p0 }
  0x1e   :  { %160 = vmatpush1.bf16.msra.mxu0 %v419_v15 }
  0x1f   :  { %169 = vmatprep.subr.bf16.mxu0 %v452_v1 }
  0x22   :  { %170 = vmatpush2.bf16.msra.mxu0 %v143_v18 }
  0x23   :  { %171 = vmatprep.subr.bf16.mxu0 %v452_v1 }
  0x26   :  { %172 = vmatpush2.bf16.msra.mxu0 %v421_v19 }
  0x27   :  { %173 = vmatprep.subr.bf16.mxu0 %v452_v1 }
  0x2a   :  { %174 = vmatpush2.bf16.msra.mxu0 %v422_v20 }
  0x2b   :  { %175 = vmatprep.subr.bf16.mxu0 %v452_v1 }
  0x2e   :  { %176 = vmatpush2.bf16.msra.mxu0 %v423_v21 }
  0x31   :  { %178 = vmatmul.mubr.bf16.vlgmr.msra.gmra.mxu0 %v30_v23 }
  0xf1   :  { %v179_v27 = vpop.f32.mrf.mxu0 }
  0xf2   :  { %v180_v28 = vadd.f32 %v355_v26, %v179_v27 }
  0xf3   :  { %v181_v29 = vpop.f32.mrf.mxu0 }
  0xf4   :  { %v185_v30 = vmax.f32 %v180_v28, 0.0 }
  0xf5   :  { %v182_v31 = vpop.f32.mrf.mxu0 }
  0xf6   :  { %v186_v33 = vpack.c.bf16 %v185_v30, %v185_v30 }
  0xf7   :  { %v183_v34 = vpop.f32.mrf.mxu0 }
  0xf8   :  { %396 = vmatmul.mubr.msk.bf16.vlgmr.msra.gmra.mxu1 %vm226_vm4, %v186_v33 }
  0xf9   :  { %400 = vmatpush3.bf16.msra.mxu1 %v428_v32  ;;  %403 = vmatprep.mubr.msk.bf16.mxu1 %vm455_vm3, %v453_v4 }
  0xfa   :  { %401 = vmatprep.subr.bf16.mxu1 %v453_v4 }
  0xfd   :  { %402 = vmatpush3.bf16.msra.mxu1 %v429_v35 }
 0x1b8   :  { %v264_v37 = vpop.f32.mrf.mxu1 }
 0x1b9   :  { %v265_v38 = vadd.f32 %v369_v36, %v264_v37 }
 0x1ba   :  { %v397_v39 = vpop.f32.mrf.mxu1 }
 0x1bb   :  { %v270_v40 = vmax.f32 %v265_v38, 0.0 }
 0x1bc   :  { %v267_v41 = vpop.f32.mrf.mxu1 }
 0x1bd   :  { %v271_v42 = vpack.c.bf16 %v270_v40, %v270_v40 }
 0x1be   :  { %v398_v43 = vpop.f32.mrf.mxu1 }
 0x1bf   :  { %404 = vmatmul.mubr.msk.bf16.vlgmr.msra.gmra.mxu1 %vm295_vm5, %v271_v42 }
 0x27f   :  { %v333_v45 = vpop.f32.mrf.mxu1 }
 0x280   :  { %v334_v46 = vadd.f32 %v375_v44, %v333_v45 }
 0x281   :  { %v405_v47 = vpop.f32.mrf.mxu1 }
 0x282   :  { %340 = vst.msk [vmem:[#allocation2] sm:$0xff] %vm339_vm6, %v334_v46 }
 0x283   :  { %v336_v48 = vpop.f32.mrf.mxu1 }
 0x284   :  { %441 = shalt.err (!%p438_p4)
}
 0x285   :  { %350 = dma.vmem_to_hbm [thread:$0]  %s348_s5, 128, %s584_s7, [#allocation3]   ;;  %v406_v49 = vpop.f32.mrf.mxu1 }
 0x286   :  { %450 = dma.done.wait [#allocation3], 128  }
 0x287   :  { %451 = vsyncadd [#allocation3], 4294967168 }
 0x288   :  { %354 = vsyncpa [#allocation3], 1 }

</bundles_post_ra>
